<compile_context>
chip_gen: v7x
topology: tpu7x:2x2x1
jax: 0.10.0
libtpu: 0.0.40
codegen_flags: <defaults>
</compile_context>

<pallas_src>
import jax
import jax.numpy as jnp
from jax.experimental import pallas as pl
from jax.experimental.pallas import tpu as pltpu


def _round_up(x, m):
    return ((x + m - 1) // m) * m


def _pick_tb(n, cap):
    """Batch tile: multiple of 8 (sublane), >=2 grid steps when n > 8 so both
    v7x TensorCores get work, capped so double-buffered tiles fit VMEM."""
    if n <= 8:
        return n                       # block == full array dim (allowed)
    tb = _round_up(pl.cdiv(n, 2), 8)   # at least 2 grid steps
    return min(tb, cap)


# ---------------------------------------------------------------------------
# Kernels
# ---------------------------------------------------------------------------

def _encode_tile(x_f32, w1, b1, w2, b2):
    """One encoder application on a VMEM-resident tile.
    x_f32: (tb, D_in) f32 | w1: (D_in, D_hid) bf16 | b1: (1, D_hid) f32
    w2: (D_hid, D_out) bf16 | b2: (1, D_out) f32   -> (tb, D_out) f32."""
    x = x_f32.astype(jnp.bfloat16)                     # VPU cast, in-kernel
    h = jnp.dot(x, w1, preferred_element_type=jnp.float32)
    h = jnp.maximum(h + b1, 0.0)                       # bias + ReLU on VPU
    y = jnp.dot(h.astype(jnp.bfloat16), w2, preferred_element_type=jnp.float32)
    return y + b2


def encoder_pair_kernel(x1_ref, x2_ref, w1_ref, b1_ref, w2_ref, b2_ref,
                        o1_ref, o2_ref):
    w1, b1 = w1_ref[...], b1_ref[...]
    w2, b2 = w2_ref[...], b2_ref[...]
    o1_ref[...] = _encode_tile(x1_ref[...], w1, b1, w2, b2).astype(o1_ref.dtype)
    o2_ref[...] = _encode_tile(x2_ref[...], w1, b1, w2, b2).astype(o2_ref.dtype)


def encoder_single_kernel(x_ref, w1_ref, b1_ref, w2_ref, b2_ref, o_ref):
    o_ref[...] = _encode_tile(x_ref[...], w1_ref[...], b1_ref[...],
                              w2_ref[...], b2_ref[...]).astype(o_ref.dtype)


# ---------------------------------------------------------------------------
# Wrappers
# ---------------------------------------------------------------------------

def prepare_encoder_params(w1, b1, w2, b2):
    """One-time prep (at init, NOT per call): transpose into kernel layout and
    cast weights to bf16 (biases stay f32). Only arrays go in the pytree."""
    return {
        "w1": jnp.asarray(w1.T, dtype=jnp.bfloat16),                 # (D_in, D_hid)
        "b1": jnp.asarray(b1, dtype=jnp.float32).reshape(1, -1),     # (1, D_hid)
        "w2": jnp.asarray(w2.T, dtype=jnp.bfloat16),                 # (D_hid, D_out)
        "b2": jnp.asarray(b2, dtype=jnp.float32).reshape(1, -1),     # (1, D_out)
    }


def _weight_specs(d_in, d_hid, d_out):
    return [
        pl.BlockSpec((d_in, d_hid), lambda i: (0, 0)),   # w1 resident
        pl.BlockSpec((1, d_hid), lambda i: (0, 0)),      # b1 resident
        pl.BlockSpec((d_hid, d_out), lambda i: (0, 0)),  # w2 resident
        pl.BlockSpec((1, d_out), lambda i: (0, 0)),      # b2 resident
    ]


def _encoder_pair_pallas(x1_2d, x2_2d, params):
    """Both encoder applications fused into one pallas_call (equal batches)."""
    w1_t, b1_2d, w2_t, b2_2d = params["w1"], params["b1"], params["w2"], params["b2"]
    d_in, d_hid = w1_t.shape
    d_out = w2_t.shape[1]                 # static (tracer shape)
    n = x1_2d.shape[0]

    # 2 inputs x 2 bufs x tb x d_in x 4 B ~= 8 MiB at tb=512, d_in=1024.
    tb = _pick_tb(n, 512)
    grid = (pl.cdiv(n, tb),)

    cost = pl.CostEstimate(
        flops=2 * 2 * n * (d_in * d_hid + d_hid * d_out),
        transcendentals=0,
        bytes_accessed=(2 * n * d_in * 4          # x1, x2 (f32)
                        + d_in * d_hid * 2        # w1 (bf16)
                        + d_hid * 4               # b1 (f32)
                        + d_hid * d_out * 2       # w2 (bf16)
                        + d_out * 4               # b2 (f32)
                        + 2 * n * d_out * 4),     # out1, out2 (f32)
    )

    out_sds = jax.ShapeDtypeStruct((n, d_out), jnp.float32)
    o1, o2 = pl.pallas_call(
        encoder_pair_kernel,
        out_shape=(out_sds, out_sds),
        grid=grid,
        in_specs=[
            pl.BlockSpec((tb, d_in), lambda i: (i, 0)),   # x1 tile (f32)
            pl.BlockSpec((tb, d_in), lambda i: (i, 0)),   # x2 tile (f32)
        ] + _weight_specs(d_in, d_hid, d_out),
        out_specs=(pl.BlockSpec((tb, d_out), lambda i: (i, 0)),
                   pl.BlockSpec((tb, d_out), lambda i: (i, 0))),
        compiler_params=pltpu.CompilerParams(
            dimension_semantics=("parallel",)),
        cost_estimate=cost,
    )(x1_2d, x2_2d, w1_t, b1_2d, w2_t, b2_2d)
    return o1, o2


def _encoder_pallas(x_2d, params):
    """Single-input encoder (used when the two batch sizes differ)."""
    w1_t, b1_2d, w2_t, b2_2d = params["w1"], params["b1"], params["w2"], params["b2"]
    d_in, d_hid = w1_t.shape
    d_out = w2_t.shape[1]
    n = x_2d.shape[0]

    tb = _pick_tb(n, 1024)
    grid = (pl.cdiv(n, tb),)

    cost = pl.CostEstimate(
        flops=2 * n * (d_in * d_hid + d_hid * d_out),
        transcendentals=0,
        bytes_accessed=(n * d_in * 4 + d_in * d_hid * 2 + d_hid * 4
                        + d_hid * d_out * 2 + d_out * 4 + n * d_out * 4),
    )

    return pl.pallas_call(
        encoder_single_kernel,
        out_shape=jax.ShapeDtypeStruct((n, d_out), jnp.float32),
        grid=grid,
        in_specs=[pl.BlockSpec((tb, d_in), lambda i: (i, 0))]
                 + _weight_specs(d_in, d_hid, d_out),
        out_specs=pl.BlockSpec((tb, d_out), lambda i: (i, 0)),
        compiler_params=pltpu.CompilerParams(
            dimension_semantics=("parallel",)),
        cost_estimate=cost,
    )(x_2d, w1_t, b1_2d, w2_t, b2_2d)


@jax.jit
def network_forward(x1, x2, params):
    """Network.forward(x1, x2) -> (encoder(x1), encoder(x2))."""
    n1, n2 = x1.shape[0], x2.shape[0]
    x1f = x1.reshape(n1, -1).astype(jnp.float32)   # no-op pass for f32 inputs
    x2f = x2.reshape(n2, -1).astype(jnp.float32)
    if n1 == n2:   # static shapes -> Python-level branch
        return _encoder_pair_pallas(x1f, x2f, params)
    return _encoder_pallas(x1f, params), _encoder_pallas(x2f, params)


def init_encoder_params(key, d_in, d_hid, d_out):
    """Deterministic synthetic init in PyTorch nn.Linear layout (f32)."""
    k1, k2, k3, k4 = jax.random.split(key, 4)
    w1 = jax.random.uniform(k1, (d_hid, d_in), jnp.float32, -1.0, 1.0) / jnp.sqrt(d_in)
    b1 = jax.random.uniform(k2, (d_hid,), jnp.float32, -1.0, 1.0) / jnp.sqrt(d_in)
    w2 = jax.random.uniform(k3, (d_out, d_hid), jnp.float32, -1.0, 1.0) / jnp.sqrt(d_hid)
    b2 = jax.random.uniform(k4, (d_out,), jnp.float32, -1.0, 1.0) / jnp.sqrt(d_hid)
    return w1, b1, w2, b2


if __name__ == "__main__":
    B, C, H, W = 2, 4, 16, 16
    D_IN, D_HID, D_OUT = C * H * W, 128, 32

    key = jax.random.PRNGKey(0)
    kx1, kx2, kp = jax.random.split(key, 3)
    x1 = jax.random.normal(kx1, (B, C, H, W), jnp.float32)
    x2 = jax.random.normal(kx2, (B, C, H, W), jnp.float32)

    w1, b1, w2, b2 = init_encoder_params(kp, D_IN, D_HID, D_OUT)
    params = prepare_encoder_params(w1, b1, w2, b2)   # one-time prep

    out1, out2 = network_forward(x1, x2, params)
    out1, out2 = jax.block_until_ready((out1, out2))

    # Reference in plain f32 JAX (same math as the PyTorch encoder).
    def ref_encoder(x):
        xf = x.reshape(x.shape[0], -1)
        return jnp.maximum(xf @ w1.T + b1, 0.0) @ w2.T + b2

    ref1, ref2 = ref_encoder(x1), ref_encoder(x2)
    assert out1.shape == (B, D_OUT) and out2.shape == (B, D_OUT)
    # bf16 weight/activation feed (f32 accumulate) -> relaxed tolerance.
    assert jnp.allclose(out1, ref1, atol=5e-2, rtol=5e-2)
    assert jnp.allclose(out2, ref2, atol=5e-2, rtol=5e-2)

    print("KERNEL_OK")
</pallas_src>

<mosaic_0001>
module attributes {stable_mosaic.version = 11 : i64} {
  func.func @encoder_pair_kernel(%arg0: i32, %arg1: memref<2x1024xf32, #tpu.memory_space<vmem>>, %arg2: memref<2x1024xf32, #tpu.memory_space<vmem>>, %arg3: memref<1024x128xbf16, #tpu.memory_space<vmem>>, %arg4: memref<1x128xf32, #tpu.memory_space<vmem>>, %arg5: memref<128x32xbf16, #tpu.memory_space<vmem>>, %arg6: memref<1x32xf32, #tpu.memory_space<vmem>>, %arg7: memref<2x32xf32, #tpu.memory_space<vmem>>, %arg8: memref<2x32xf32, #tpu.memory_space<vmem>>) attributes {dimension_semantics = [#tpu.dimension_semantics<parallel>], iteration_bounds = array<i64: 1>, scalar_prefetch = 0 : i64, scratch_operands = 0 : i64, tpu.core_type = #tpu.core_type<tc>, window_params = [{transform_indices = @transform_0, window_bounds = array<i64: 2, 1024>}, {transform_indices = @transform_1, window_bounds = array<i64: 2, 1024>}, {pipeline_mode = #tpu.pipeline_mode<synchronous>, transform_indices = @transform_2, window_bounds = array<i64: 1024, 128>}, {pipeline_mode = #tpu.pipeline_mode<synchronous>, transform_indices = @transform_3, window_bounds = array<i64: 1, 128>}, {pipeline_mode = #tpu.pipeline_mode<synchronous>, transform_indices = @transform_4, window_bounds = array<i64: 128, 32>}, {pipeline_mode = #tpu.pipeline_mode<synchronous>, transform_indices = @transform_5, window_bounds = array<i64: 1, 32>}, {transform_indices = @transform_6, window_bounds = array<i64: 2, 32>}, {transform_indices = @transform_7, window_bounds = array<i64: 2, 32>}]} {
    %c0 = arith.constant 0 : index
    %c0_0 = arith.constant 0 : index
    %0 = vector.load %arg3[%c0, %c0_0] : memref<1024x128xbf16, #tpu.memory_space<vmem>>, vector<1024x128xbf16>
    %c0_1 = arith.constant 0 : index
    %c0_2 = arith.constant 0 : index
    %1 = vector.load %arg4[%c0_1, %c0_2] : memref<1x128xf32, #tpu.memory_space<vmem>>, vector<1x128xf32>
    %c0_3 = arith.constant 0 : index
    %c0_4 = arith.constant 0 : index
    %2 = vector.load %arg5[%c0_3, %c0_4] : memref<128x32xbf16, #tpu.memory_space<vmem>>, vector<128x32xbf16>
    %c0_5 = arith.constant 0 : index
    %c0_6 = arith.constant 0 : index
    %3 = vector.load %arg6[%c0_5, %c0_6] : memref<1x32xf32, #tpu.memory_space<vmem>>, vector<1x32xf32>
    %c0_7 = arith.constant 0 : index
    %c0_8 = arith.constant 0 : index
    %4 = vector.load %arg1[%c0_7, %c0_8] : memref<2x1024xf32, #tpu.memory_space<vmem>>, vector<2x1024xf32>
    %5 = arith.truncf %4 : vector<2x1024xf32> to vector<2x1024xbf16>
    %cst = arith.constant dense<0.000000e+00> : vector<2x128xf32>
    %6 = tpu.matmul %5, %0, %cst {dimension_numbers = #tpu.dot_dimension_numbers<[1], [0], [0], [1], [0, 0, 1, 1], [], []>} : vector<2x1024xbf16>, vector<1024x128xbf16>, vector<2x128xf32> -> vector<2x128xf32>
    %7 = vector.broadcast %1 : vector<1x128xf32> to vector<2x128xf32>
    %8 = arith.addf %6, %7 : vector<2x128xf32>
    %cst_9 = arith.constant 0.000000e+00 : f32
    %9 = vector.broadcast %cst_9 : f32 to vector<2x128xf32>
    %10 = arith.maximumf %8, %9 : vector<2x128xf32>
    %11 = arith.truncf %10 : vector<2x128xf32> to vector<2x128xbf16>
    %cst_10 = arith.constant dense<0.000000e+00> : vector<2x32xf32>
    %12 = tpu.matmul %11, %2, %cst_10 {dimension_numbers = #tpu.dot_dimension_numbers<[1], [0], [0], [1], [0, 0, 1, 1], [], []>} : vector<2x128xbf16>, vector<128x32xbf16>, vector<2x32xf32> -> vector<2x32xf32>
    %13 = vector.broadcast %3 : vector<1x32xf32> to vector<2x32xf32>
    %14 = arith.addf %12, %13 : vector<2x32xf32>
    %c0_11 = arith.constant 0 : index
    %c0_12 = arith.constant 0 : index
    %15 = vector.load %arg7[%c0_11, %c0_12] : memref<2x32xf32, #tpu.memory_space<vmem>>, vector<2x32xf32>
    tpu.vector_store %arg7[%c0_11, %c0_12], %14 {strides = array<i32>} : memref<2x32xf32, #tpu.memory_space<vmem>>, vector<2x32xf32>,
    %c0_13 = arith.constant 0 : index
    %c0_14 = arith.constant 0 : index
    %16 = vector.load %arg2[%c0_13, %c0_14] : memref<2x1024xf32, #tpu.memory_space<vmem>>, vector<2x1024xf32>
    %17 = arith.truncf %16 : vector<2x1024xf32> to vector<2x1024xbf16>
    %cst_15 = arith.constant dense<0.000000e+00> : vector<2x128xf32>
    %18 = tpu.matmul %17, %0, %cst_15 {dimension_numbers = #tpu.dot_dimension_numbers<[1], [0], [0], [1], [0, 0, 1, 1], [], []>} : vector<2x1024xbf16>, vector<1024x128xbf16>, vector<2x128xf32> -> vector<2x128xf32>
    %19 = vector.broadcast %1 : vector<1x128xf32> to vector<2x128xf32>
    %20 = arith.addf %18, %19 : vector<2x128xf32>
    %cst_16 = arith.constant 0.000000e+00 : f32
    %21 = vector.broadcast %cst_16 : f32 to vector<2x128xf32>
    %22 = arith.maximumf %20, %21 : vector<2x128xf32>
    %23 = arith.truncf %22 : vector<2x128xf32> to vector<2x128xbf16>
    %cst_17 = arith.constant dense<0.000000e+00> : vector<2x32xf32>
    %24 = tpu.matmul %23, %2, %cst_17 {dimension_numbers = #tpu.dot_dimension_numbers<[1], [0], [0], [1], [0, 0, 1, 1], [], []>} : vector<2x128xbf16>, vector<128x32xbf16>, vector<2x32xf32> -> vector<2x32xf32>
    %25 = vector.broadcast %3 : vector<1x32xf32> to vector<2x32xf32>
    %26 = arith.addf %24, %25 : vector<2x32xf32>
    %c0_18 = arith.constant 0 : index
    %c0_19 = arith.constant 0 : index
    %27 = vector.load %arg8[%c0_18, %c0_19] : memref<2x32xf32, #tpu.memory_space<vmem>>, vector<2x32xf32>
    tpu.vector_store %arg8[%c0_18, %c0_19], %26 {strides = array<i32>} : memref<2x32xf32, #tpu.memory_space<vmem>>, vector<2x32xf32>,
    return
  }
  func.func @transform_0(%arg0: i32) -> (i32, i32) {
    %c0_i32 = arith.constant 0 : i32
    %c0_i32_0 = arith.constant 0 : i32
    return %arg0, %c0_i32 : i32, i32
  }
  func.func @transform_1(%arg0: i32) -> (i32, i32) {
    %c0_i32 = arith.constant 0 : i32
    %c0_i32_0 = arith.constant 0 : i32
    return %arg0, %c0_i32 : i32, i32
  }
  func.func @transform_2(%arg0: i32) -> (i32, i32) {
    %c0_i32 = arith.constant 0 : i32
    %c0_i32_0 = arith.constant 0 : i32
    %c0_i32_1 = arith.constant 0 : i32
    return %c0_i32, %c0_i32_0 : i32, i32
  }
  func.func @transform_3(%arg0: i32) -> (i32, i32) {
    %c0_i32 = arith.constant 0 : i32
    %c0_i32_0 = arith.constant 0 : i32
    %c0_i32_1 = arith.constant 0 : i32
    return %c0_i32, %c0_i32_0 : i32, i32
  }
  func.func @transform_4(%arg0: i32) -> (i32, i32) {
    %c0_i32 = arith.constant 0 : i32
    %c0_i32_0 = arith.constant 0 : i32
    %c0_i32_1 = arith.constant 0 : i32
    return %c0_i32, %c0_i32_0 : i32, i32
  }
  func.func @transform_5(%arg0: i32) -> (i32, i32) {
    %c0_i32 = arith.constant 0 : i32
    %c0_i32_0 = arith.constant 0 : i32
    %c0_i32_1 = arith.constant 0 : i32
    return %c0_i32, %c0_i32_0 : i32, i32
  }
  func.func @transform_6(%arg0: i32) -> (i32, i32) {
    %c0_i32 = arith.constant 0 : i32
    %c0_i32_0 = arith.constant 0 : i32
    return %arg0, %c0_i32 : i32, i32
  }
  func.func @transform_7(%arg0: i32) -> (i32, i32) {
    %c0_i32 = arith.constant 0 : i32
    %c0_i32_0 = arith.constant 0 : i32
    return %arg0, %c0_i32 : i32, i32
  }
}

</mosaic_0001>

<bundles_post_ra>
// kernel: network_forward.1
= control target key start
LH: loop header
LB: loop body
LE: loop exit
PB: predicated region body
PF: predicated region fallthrough
CT: control target
= control target key end

     0   :  { %13 = vsyncpa [#allocation3], 0  ;;  %s2068_s0 = inlined_call_operand.vmem [shape: f32[2,1024], index: 0, kind: input, shape index: {}]   ;;  %s2069_s1 = inlined_call_operand.vmem [shape: f32[2,1024], index: 1, kind: input, shape index: {}]   ;;  %s2070_s2 = inlined_call_operand.hbm [shape: bf16[1024,128], index: 2, kind: input, shape index: {}]   ;;  %s2071_s3 = inlined_call_operand.vmem [shape: f32[1,128], index: 3, kind: input, shape index: {}]   ;;  %s2072_s4 = inlined_call_operand.vmem [shape: bf16[128,32], index: 4, kind: input, shape index: {}]   ;;  %s2073_s5 = inlined_call_operand.vmem [shape: f32[1,32], index: 5, kind: input, shape index: {}]   ;;  %s2074_s6 = inlined_call_operand.hbm [shape: f32[2,32], index: 6, kind: output, shape index: {0}]   ;;  %s2075_s7 = inlined_call_operand.hbm [shape: f32[2,32], index: 7, kind: output, shape index: {1}]  }
   0x1   :  { %14 = vsyncpa [#allocation4], 0 }
   0x2   :  { %15 = vsyncpa [#allocation7], 0  ;;  %s1640_s24 = smov [#allocation2]   ;;  %s1568_s28 = scalar_lea.hbm %s2070_s2, 8192 }
   0x3   :  { %s25_s25 = sshll.u32 %s1640_s24, 4  ;;  %p1569_p0 = scmp.ne.s32.totalorder %s2070_s2, %s1568_s28  ;;  %s26_s25 = int_to_ptr.vmem [resolvable:$true] %s25_s25 }
   0x4   :  { %p1572_p1 = scmp.lt.u32.totalorder %s1568_s28, %s2070_s2 }
   0x6   :  { %p1574_p2 = pnand %p1572_p1, %p1569_p0 }
   0x8   :  { %1577 = shalt.err (!%p1574_p2)
}
   0x9   :  { %s1578_s10 = scalar_lea.vmem %s26_s25, 8192  ;;  %p1583_p4 = scmp.lt.s32.totalorder %s26_s25, %s26_s25 }
   0xa   :  { %p1579_p3 = scmp.ne.s32.totalorder %s26_s25, %s1578_s10  ;;  %p1584_p5 = scmp.lt.s32.totalorder %s1578_s10, %s1578_s10 }
   0xc   :  { %p1585_p6 = por %p1584_p5, %p1583_p4 }
   0xe   :  { %p1586_p7 = pnand %p1585_p6, %p1579_p3 }
  0x10   :  { %1589 = shalt.err (!%p1586_p7)
}
  0x11   :  { %s1641_s11 = smov 64   ;;  %s1642_s12 = smov 4  }
  0x12   :  { %31 = dma.hbm_to_vmem [thread:$0]  %s2070_s2, 8192, %s26_s25, [#allocation3], %s1641_s11, %s1641_s11, %s1642_s12  }
  0x13   :  { %1634 = dma.done.wait [#allocation3], 8192  }
  0x14   :  { %1635 = vsyncadd [#allocation3], 4294959104  ;;  %v1700_v0 = vld [vmem:[#allocation2 + $0x40] sm:$0xff]   ;;  %v1711_v4 = vld [vmem:[#allocation2 + $0x48] sm:$0xff]   ;;  %v1643_v22 = vmov 1983009808   ;;  %v196_v24 = vlaneseq }
  0x15   :  { %v1702_v1 = vld [vmem:[#allocation2 + $0xc0] sm:$0xff]   ;;  %1250 = vmatprep.subr.bf16.mxu0 %v1700_v0  ;;  %v1714_v5 = vld [vmem:[#allocation2 + $0xc8] sm:$0xff]   ;;  %v1723_v8 = vld [vmem:[#allocation2 + $0x50] sm:$0xff]   ;;  %v194_v23 = vunpack.c.l.s4 %v1643_v22  ;;  %vm1645_vm0 = vmmov 0   ;;  %vm888_vm1 = vcmask 254976  }
  0x16   :  { %v1705_v2 = vld [vmem:[#allocation2] sm:$0xff]   ;;  %1272 = vmatprep.subr.bf16.mxu1 %v1702_v1  ;;  %v1717_v6 = vld [vmem:[#allocation2 + $0x8] sm:$0xff]   ;;  %v1726_v9 = vld [vmem:[#allocation2 + $0xd0] sm:$0xff]   ;;  %v197_v30 = vshrl.u32 %v196_v24, 7 }
  0x17   :  { %v1708_v3 = vld [vmem:[#allocation2 + $0x80] sm:$0xff]   ;;  %1251 = vmatpush3.bf16.msra.mxu0 %v1705_v2  ;;  %v1720_v7 = vld [vmem:[#allocation2 + $0x88] sm:$0xff]   ;;  %v1729_v10 = vld [vmem:[#allocation2 + $0x10] sm:$0xff]   ;;  %v195_v29 = vunpack.c.0.s8 %v194_v23 }
  0x18   :  { %1273 = vmatpush3.bf16.msra.mxu1 %v1708_v3  ;;  %1252 = vmatprep.subr.bf16.mxu0 %v1711_v4  ;;  %v1732_v11 = vld [vmem:[#allocation2 + $0x90] sm:$0xff]   ;;  %v1735_v12 = vld [vmem:[#allocation2 + $0x58] sm:$0xff]   ;;  %v1747_v16 = vld [vmem:[#allocation2 + $0x60] sm:$0xff]  }
  0x19   :  { %1274 = vmatprep.subr.bf16.mxu1 %v1714_v5  ;;  %v1738_v13 = vld [vmem:[#allocation2 + $0xd8] sm:$0xff]   ;;  %v1750_v17 = vld [vmem:[#allocation2 + $0xe0] sm:$0xff]   ;;  %v1759_v20 = vld [vmem:[#allocation2 + $0x68] sm:$0xff]   ;;  %v1788_v35 = vsub.s32 %v195_v29, %v197_v30 }
  0x1a   :  { %v1741_v14 = vld [vmem:[#allocation2 + $0x18] sm:$0xff]   ;;  %v1753_v18 = vld [vmem:[#allocation2 + $0x20] sm:$0xff]   ;;  %v1762_v21 = vld [vmem:[#allocation2 + $0xe8] sm:$0xff]  }
  0x1b   :  { %1253 = vmatpush3.bf16.msra.mxu0 %v1717_v6  ;;  %v1744_v15 = vld [vmem:[#allocation2 + $0x98] sm:$0xff]   ;;  %v1756_v19 = vld [vmem:[#allocation2 + $0xa0] sm:$0xff]   ;;  %v1765_v25 = vld [vmem:[#allocation2 + $0x28] sm:$0xff]  }
  0x1c   :  { %1275 = vmatpush3.bf16.msra.mxu1 %v1720_v7  ;;  %1254 = vmatprep.subr.bf16.mxu0 %v1723_v8  ;;  %v1768_v26 = vld [vmem:[#allocation2 + $0xa8] sm:$0xff]   ;;  %v1771_v27 = vld [vmem:[#allocation2 + $0x70] sm:$0xff]   ;;  %v1783_v33 = vld [vmem:[#allocation2 + $0x78] sm:$0xff]  }
  0x1d   :  { %1276 = vmatprep.subr.bf16.mxu1 %v1726_v9  ;;  %v1774_v28 = vld [vmem:[#allocation2 + $0xf0] sm:$0xff]   ;;  %v1786_v34 = vld [vmem:[#allocation2 + $0xf8] sm:$0xff]   ;;  %v188_v38 = vld [vmem:[%s2068_s0] sm:$0xff] }
  0x1e   :  { %v1777_v31 = vld [vmem:[#allocation2 + $0x30] sm:$0xff]   ;;  %v1791_v36 = vld [vmem:[#allocation2 + $0x38] sm:$0xff]   ;;  %v199_v39 = vrot.slane %v188_v38, %v1788_v35  ;;  %v192_v40 = vcombine.high %v188_v38, %v188_v38  ;;  %v1802_v41 = vld [vmem:[#allocation2 + $0x140] sm:$0xff]  }
  0x1f   :  { %1255 = vmatpush3.bf16.msra.mxu0 %v1729_v10  ;;  %v1780_v32 = vld [vmem:[#allocation2 + $0xb0] sm:$0xff]   ;;  %v1794_v37 = vld [vmem:[#allocation2 + $0xb8] sm:$0xff]   ;;  %v1804_v42 = vld [vmem:[#allocation2 + $0x1c0] sm:$0xff]  }
  0x20   :  { %1277 = vmatpush3.bf16.msra.mxu1 %v1732_v11  ;;  %1256 = vmatprep.subr.bf16.mxu0 %v1735_v12  ;;  %v207_v43 = vcombine.high %v199_v39, %v199_v39  ;;  %v206_v44 = vrot.slane %v192_v40, %v1788_v35  ;;  %v234_v45 = vpack.c.bf16 %v199_v39, %v199_v39  ;;  %v1809_v46 = vld [vmem:[#allocation2 + $0x100] sm:$0xff]   ;;  %v1813_v51 = vld [vmem:[#allocation2 + $0x148] sm:$0xff]   ;;  %v1823_v56 = vld [vmem:[#allocation2 + $0x150] sm:$0xff]  }
  0x21   :  { %1278 = vmatprep.subr.bf16.mxu1 %v1738_v13  ;;  %v1811_v49 = vld [vmem:[#allocation2 + $0x180] sm:$0xff]   ;;  %v1815_v53 = vld [vmem:[#allocation2 + $0x1c8] sm:$0xff]   ;;  %v1826_v57 = vld [vmem:[#allocation2 + $0x1d0] sm:$0xff]  }
  0x22   :  { %v235_v47 = vpack.c.bf16 %v207_v43, %v207_v43  ;;  %v208_v48 = vcombine.high %v206_v44, %v206_v44  ;;  %v236_v50 = vpack.c.bf16 %v206_v44, %v206_v44  ;;  %2087 = vst [vmem:[#allocation11_spill] sm:$0xff] %v1815_v53  ;;  %v1817_v54 = vld [vmem:[#allocation2 + $0x108] sm:$0xff]   ;;  %2089 = vst [vmem:[#allocation13_spill] sm:$0xff] %v1826_v57  ;;  %v1829_v58 = vld [vmem:[#allocation2 + $0x110] sm:$0xff]  }
  0x23   :  { %1257 = vmatpush3.bf16.msra.mxu0 %v1741_v14  ;;  %v1820_v55 = vld [vmem:[#allocation2 + $0x188] sm:$0xff]   ;;  %v1832_v59 = vld [vmem:[#allocation2 + $0x190] sm:$0xff]   ;;  %v1835_v60 = vld [vmem:[#allocation2 + $0x158] sm:$0xff]  }
  0x24   :  { %1279 = vmatpush3.bf16.msra.mxu1 %v1744_v15  ;;  %1258 = vmatprep.subr.bf16.mxu0 %v1747_v16  ;;  %v237_v52 = vpack.c.bf16 %v208_v48, %v208_v48  ;;  %2088 = vst [vmem:[#allocation12_spill] sm:$0xff] %v1820_v55  ;;  %2090 = vst [vmem:[#allocation14_spill] sm:$0xff] %v1832_v59  ;;  %v1838_v61 = vld [vmem:[#allocation2 + $0x1d8] sm:$0xff]   ;;  %v1847_v22 = vld [vmem:[#allocation2 + $0x160] sm:$0xff]  }
  0x25   :  { %1280 = vmatprep.subr.bf16.mxu1 %v1750_v17  ;;  %664 = vmatprep.mubr.bf16.mxu0 %v235_v47  ;;  %2091 = vst [vmem:[#allocation15_spill] sm:$0xff] %v1838_v61  ;;  %v1841_v62 = vld [vmem:[#allocation2 + $0x118] sm:$0xff]   ;;  %v1850_v23 = vld [vmem:[#allocation2 + $0x1e0] sm:$0xff]   ;;  %v1859_v30 = vld [vmem:[#allocation2 + $0x168] sm:$0xff]  }
  0x26   :  { %704 = vmatprep.mubr.bf16.mxu1 %v237_v52  ;;  %v1844_v63 = vld [vmem:[#allocation2 + $0x198] sm:$0xff]   ;;  %2093 = vst [vmem:[#allocation17_spill] sm:$0xff] %v1850_v23  ;;  %v1853_v24 = vld [vmem:[#allocation2 + $0x120] sm:$0xff]   ;;  %v1862_v38 = vld [vmem:[#allocation2 + $0x1e8] sm:$0xff]  }
  0x27   :  { %1259 = vmatpush3.bf16.msra.mxu0 %v1753_v18  ;;  %2092 = vst [vmem:[#allocation16_spill] sm:$0xff] %v1844_v63  ;;  %v1856_v29 = vld [vmem:[#allocation2 + $0x1a0] sm:$0xff]   ;;  %2095 = vst [vmem:[#allocation19_spill] sm:$0xff] %v1862_v38  ;;  %v1865_v39 = vld [vmem:[#allocation2 + $0x128] sm:$0xff]  }
  0x28   :  { %1281 = vmatpush3.bf16.msra.mxu1 %v1756_v19  ;;  %1260 = vmatprep.subr.bf16.mxu0 %v1759_v20  ;;  %2094 = vst [vmem:[#allocation18_spill] sm:$0xff] %v1856_v29  ;;  %v1868_v40 = vld [vmem:[#allocation2 + $0x1a8] sm:$0xff]   ;;  %v1871_v43 = vld [vmem:[#allocation2 + $0x170] sm:$0xff]   ;;  %v1883_v48 = vld [vmem:[#allocation2 + $0x178] sm:$0xff]  }
  0x29   :  { %1282 = vmatprep.subr.bf16.mxu1 %v1762_v21  ;;  %2096 = vst [vmem:[#allocation20_spill] sm:$0xff] %v1868_v40  ;;  %v1874_v44 = vld [vmem:[#allocation2 + $0x1f0] sm:$0xff]   ;;  %v1889_v52 = vld [vmem:[#allocation2 + $0x138] sm:$0xff]  }
  0x2a   :  { %2097 = vst [vmem:[#allocation21_spill] sm:$0xff] %v1874_v44  ;;  %v1880_v47 = vld [vmem:[#allocation2 + $0x1b0] sm:$0xff]  }
  0x2b   :  { %1261 = vmatpush3.bf16.msra.mxu0 %v1765_v25 }
  0x2c   :  { %1283 = vmatpush3.bf16.msra.mxu1 %v1768_v26  ;;  %1262 = vmatprep.subr.bf16.mxu0 %v1771_v27 }
  0x2d   :  { %1284 = vmatprep.subr.bf16.mxu1 %v1774_v28 }
  0x2f   :  { %1263 = vmatpush3.bf16.msra.mxu0 %v1777_v31 }
  0x30   :  { %1285 = vmatpush3.bf16.msra.mxu1 %v1780_v32  ;;  %1264 = vmatprep.subr.bf16.mxu0 %v1783_v33 }
  0x31   :  { %1286 = vmatprep.subr.bf16.mxu1 %v1786_v34 }
  0x33   :  { %1265 = vmatpush3.bf16.msra.mxu0 %v1791_v36 }
  0x34   :  { %1287 = vmatpush3.bf16.msra.mxu1 %v1794_v37  ;;  %1294 = vmatprep.subr.bf16.mxu0 %v1802_v41 }
  0x35   :  { %1316 = vmatprep.subr.bf16.mxu1 %v1804_v42 }
  0x36   :  { %665 = vmatmul.mubr.bf16.vlgmr.msra.gmra.mrb[0].mxu0 %v234_v45  ;;  %v1877_v45 = vld [vmem:[#allocation2 + $0x130] sm:$0xff]  }
  0x37   :  { %1295 = vmatpush3.bf16.msra.mxu0 %v1809_v46  ;;  %705 = vmatmul.mubr.bf16.vlgmr.msra.gmra.mrb[0].mxu1 %v236_v50  ;;  %v1886_v50 = vld [vmem:[#allocation2 + $0x1f8] sm:$0xff]  }
  0x38   :  { %1296 = vmatprep.subr.bf16.mxu0 %v1813_v51  ;;  %1317 = vmatpush3.bf16.msra.mxu1 %v1811_v49 }
  0x39   :  { %1318 = vmatprep.subr.bf16.mxu1 %v1815_v53 }
  0x3b   :  { %1297 = vmatpush3.bf16.msra.mxu0 %v1817_v54 }
  0x3c   :  { %1298 = vmatprep.subr.bf16.mxu0 %v1823_v56  ;;  %1319 = vmatpush3.bf16.msra.mxu1 %v1820_v55 }
  0x3d   :  { %1320 = vmatprep.subr.bf16.mxu1 %v1826_v57 }
  0x3f   :  { %1299 = vmatpush3.bf16.msra.mxu0 %v1829_v58 }
  0x40   :  { %1300 = vmatprep.subr.bf16.mxu0 %v1835_v60  ;;  %1321 = vmatpush3.bf16.msra.mxu1 %v1832_v59 }
  0x41   :  { %1322 = vmatprep.subr.bf16.mxu1 %v1838_v61 }
  0x43   :  { %1301 = vmatpush3.bf16.msra.mxu0 %v1841_v62 }
  0x44   :  { %1302 = vmatprep.subr.bf16.mxu0 %v1847_v22  ;;  %1323 = vmatpush3.bf16.msra.mxu1 %v1844_v63 }
  0x45   :  { %1324 = vmatprep.subr.bf16.mxu1 %v1850_v23 }
  0x47   :  { %1303 = vmatpush3.bf16.msra.mxu0 %v1853_v24 }
  0x48   :  { %1304 = vmatprep.subr.bf16.mxu0 %v1859_v30  ;;  %1325 = vmatpush3.bf16.msra.mxu1 %v1856_v29  ;;  %v1895_v29 = vld [vmem:[#allocation2 + $0x1b8] sm:$0xff]  }
  0x49   :  { %1326 = vmatprep.subr.bf16.mxu1 %v1862_v38  ;;  %v189_v38 = vld [vmem:[%s2068_s0 + $0x8] sm:$0xff] }
  0x4a   :  { %v216_v23 = vrot.slane %v189_v38, %v1788_v35  ;;  %v209_v63 = vcombine.high %v189_v38, %v189_v38 }
  0x4b   :  { %1305 = vmatpush3.bf16.msra.mxu0 %v1865_v39 }
  0x4c   :  { %1306 = vmatprep.subr.bf16.mxu0 %v1871_v43  ;;  %1327 = vmatpush3.bf16.msra.mxu1 %v1868_v40  ;;  %v224_v40 = vcombine.high %v216_v23, %v216_v23  ;;  %v238_v61 = vpack.c.bf16 %v216_v23, %v216_v23 }
  0x4d   :  { %1328 = vmatprep.subr.bf16.mxu1 %v1874_v44  ;;  %v223_v44 = vrot.slane %v209_v63, %v1788_v35 }
  0x4e   :  { %v239_v59 = vpack.c.bf16 %v224_v40, %v224_v40 }
  0x4f   :  { %1307 = vmatpush3.bf16.msra.mxu0 %v1877_v45  ;;  %v225_v57 = vcombine.high %v223_v44, %v223_v44  ;;  %v240_v55 = vpack.c.bf16 %v223_v44, %v223_v44 }
  0x50   :  { %1308 = vmatprep.subr.bf16.mxu0 %v1883_v48  ;;  %1329 = vmatpush3.bf16.msra.mxu1 %v1880_v47 }
  0x51   :  { %1330 = vmatprep.subr.bf16.mxu1 %v1886_v50  ;;  %744 = vmatprep.mubr.bf16.mxu0 %v239_v59  ;;  %v241_v53 = vpack.c.bf16 %v225_v57, %v225_v57 }
  0x53   :  { %1309 = vmatpush3.bf16.msra.mxu0 %v1889_v52  ;;  %784 = vmatprep.mubr.bf16.mxu1 %v241_v53  ;;  %v1998_v53 = vld [vmem:[%s2071_s3] ss:$0 sm:$0xff] }
  0x54   :  { %1331 = vmatpush3.bf16.msra.mxu1 %v1895_v29 }
  0x55   :  { %1347 = vmatprep.subr.bf16.mxu1 %v1700_v0  ;;  %v1558_v0 = vld [vmem:[%s2072_s4] sm:$0xff]  }
  0x56   :  { %745 = vmatmul.mubr.bf16.vlgmr.msra.gmra.mrb[4].mxu0 %v238_v61 }
  0x57   :  { %785 = vmatmul.mubr.bf16.vlgmr.msra.gmra.mrb[4].mxu1 %v240_v55 }
  0x58   :  { %1348 = vmatpush3.bf16.msra.mxu1 %v1705_v2  ;;  %v1644_v2 = vmov 0.0  }
  0x59   :  { %1349 = vmatprep.subr.bf16.mxu1 %v1711_v4  ;;  %1444 = vmatprep.subr.bf16.mxu0 %v1644_v2  ;;  %v1559_v4 = vld [vmem:[%s2072_s4 + $0x8] sm:$0xff]  }
  0x5a   :  { %1445 = vmatpush3.bf16.msra.mxu0 %v1558_v0  ;;  %1460 = vmatprep.mubr.msk.bf16.mxu0 %vm1645_vm0, %v1644_v2 }
  0x5b   :  { %1446 = vmatprep.subr.bf16.mxu0 %v1644_v2 }
  0x5c   :  { %1350 = vmatpush3.bf16.msra.mxu1 %v1717_v6  ;;  %v1560_v6 = vld [vmem:[%s2072_s4 + $0x10] sm:$0xff]  }
  0x5d   :  { %1351 = vmatprep.subr.bf16.mxu1 %v1723_v8  ;;  %v1561_v8 = vld [vmem:[%s2072_s4 + $0x18] sm:$0xff]  }
  0x5e   :  { %1447 = vmatpush3.bf16.msra.mxu0 %v1559_v4 }
  0x5f   :  { %1448 = vmatprep.subr.bf16.mxu0 %v1644_v2 }
  0x60   :  { %1352 = vmatpush3.bf16.msra.mxu1 %v1729_v10  ;;  %v1562_v10 = vld [vmem:[%s2072_s4 + $0x20] sm:$0xff]  }
  0x61   :  { %1353 = vmatprep.subr.bf16.mxu1 %v1735_v12  ;;  %v1563_v12 = vld [vmem:[%s2072_s4 + $0x28] sm:$0xff]  }
  0x62   :  { %1449 = vmatpush3.bf16.msra.mxu0 %v1560_v6 }
  0x63   :  { %1450 = vmatprep.subr.bf16.mxu0 %v1644_v2 }
  0x64   :  { %1354 = vmatpush3.bf16.msra.mxu1 %v1741_v14  ;;  %v1564_v14 = vld [vmem:[%s2072_s4 + $0x30] sm:$0xff]  }
  0x65   :  { %1355 = vmatprep.subr.bf16.mxu1 %v1747_v16  ;;  %v1565_v16 = vld [vmem:[%s2072_s4 + $0x38] sm:$0xff]  }
  0x66   :  { %1451 = vmatpush3.bf16.msra.mxu0 %v1561_v8 }
  0x67   :  { %1452 = vmatprep.subr.bf16.mxu0 %v1644_v2 }
  0x68   :  { %1356 = vmatpush3.bf16.msra.mxu1 %v1753_v18  ;;  %v1956_v18 = vld [vmem:[%s2069_s1] sm:$0xff] }
  0x69   :  { %1357 = vmatprep.subr.bf16.mxu1 %v1759_v20  ;;  %v901_v20 = vrot.slane %v1956_v18, %v1788_v35  ;;  %v894_v23 = vcombine.high %v1956_v18, %v1956_v18 }
  0x6a   :  { %1453 = vmatpush3.bf16.msra.mxu0 %v1562_v10 }
  0x6b   :  { %1454 = vmatprep.subr.bf16.mxu0 %v1644_v2  ;;  %v908_v38 = vrot.slane %v894_v23, %v1788_v35 }
  0x6c   :  { %1358 = vmatpush3.bf16.msra.mxu1 %v1765_v25  ;;  %v909_v25 = vcombine.high %v901_v20, %v901_v20 }
  0x6d   :  { %1359 = vmatprep.subr.bf16.mxu1 %v1771_v27 }
  0x6e   :  { %1455 = vmatpush3.bf16.msra.mxu0 %v1563_v12  ;;  %v937_v27 = vpack.c.bf16 %v909_v25, %v909_v25 }
  0x6f   :  { %1456 = vmatprep.subr.bf16.mxu0 %v1644_v2 }
  0x70   :  { %1360 = vmatpush3.bf16.msra.mxu1 %v1777_v31  ;;  %v936_v31 = vpack.c.bf16 %v901_v20, %v901_v20  ;;  %976 = vmatprep.mubr.bf16.mxu1 %v937_v27 }
  0x71   :  { %1361 = vmatprep.subr.bf16.mxu1 %v1783_v33 }
  0x72   :  { %1457 = vmatpush3.bf16.msra.mxu0 %v1564_v14 }
  0x73   :  { %1458 = vmatprep.subr.bf16.mxu0 %v1644_v2 }
  0x74   :  { %1362 = vmatpush3.bf16.msra.mxu1 %v1791_v36 }
  0x75   :  { %1391 = vmatprep.subr.bf16.mxu1 %v1802_v41 }
  0x76   :  { %1459 = vmatpush3.bf16.msra.mxu0 %v1565_v16 }
  0x77   :  { %1369 = vmatprep.subr.bf16.mxu0 %v1702_v1  ;;  %977 = vmatmul.mubr.bf16.vlgmr.msra.gmra.mrb[8].mxu1 %v936_v31  ;;  %v1978_v1 = vld [vmem:[%s2069_s1 + $0x8] sm:$0xff] }
  0x78   :  { %1392 = vmatpush3.bf16.msra.mxu1 %v1809_v46  ;;  %v918_v33 = vrot.slane %v1978_v1, %v1788_v35 }
  0x79   :  { %1393 = vmatprep.subr.bf16.mxu1 %v1813_v51 }
  0x7a   :  { %v926_v36 = vcombine.high %v918_v33, %v918_v33  ;;  %v940_v46 = vpack.c.bf16 %v918_v33, %v918_v33 }
  0x7c   :  { %1394 = vmatpush3.bf16.msra.mxu1 %v1817_v54  ;;  %v941_v41 = vpack.c.bf16 %v926_v36, %v926_v36 }
  0x7d   :  { %1395 = vmatprep.subr.bf16.mxu1 %v1823_v56 }
  0x7e   :  { %1056 = vmatprep.mubr.bf16.mxu1 %v941_v41 }
  0x80   :  { %1396 = vmatpush3.bf16.msra.mxu1 %v1829_v58 }
  0x81   :  { %1397 = vmatprep.subr.bf16.mxu1 %v1835_v60 }
  0x84   :  { %1398 = vmatpush3.bf16.msra.mxu1 %v1841_v62 }
  0x85   :  { %1399 = vmatprep.subr.bf16.mxu1 %v1847_v22 }
  0x88   :  { %1400 = vmatpush3.bf16.msra.mxu1 %v1853_v24 }
  0x89   :  { %1401 = vmatprep.subr.bf16.mxu1 %v1859_v30 }
  0x8c   :  { %1402 = vmatpush3.bf16.msra.mxu1 %v1865_v39 }
  0x8d   :  { %1403 = vmatprep.subr.bf16.mxu1 %v1871_v43 }
  0x90   :  { %1404 = vmatpush3.bf16.msra.mxu1 %v1877_v45 }
  0x91   :  { %1405 = vmatprep.subr.bf16.mxu1 %v1883_v48 }
  0x94   :  { %1406 = vmatpush3.bf16.msra.mxu1 %v1889_v52 }
  0x95   :  { %1464 = vmatprep.subr.bf16.mxu1 %v1644_v2 }
  0x97   :  { %1057 = vmatmul.mubr.bf16.vlgmr.msra.gmra.mrb[12].mxu1 %v940_v46 }
  0x98   :  { %1465 = vmatpush3.bf16.msra.mxu1 %v1558_v0  ;;  %1480 = vmatprep.mubr.msk.bf16.mxu1 %vm1645_vm0, %v1644_v2 }
  0x99   :  { %1466 = vmatprep.subr.bf16.mxu1 %v1644_v2 }
  0x9c   :  { %1467 = vmatpush3.bf16.msra.mxu1 %v1559_v4  ;;  %v910_v4 = vcombine.high %v908_v38, %v908_v38 }
  0x9d   :  { %1468 = vmatprep.subr.bf16.mxu1 %v1644_v2 }
  0xa0   :  { %1469 = vmatpush3.bf16.msra.mxu1 %v1560_v6 }
  0xa1   :  { %1470 = vmatprep.subr.bf16.mxu1 %v1644_v2 }
  0xa4   :  { %1471 = vmatpush3.bf16.msra.mxu1 %v1561_v8 }
  0xa5   :  { %1472 = vmatprep.subr.bf16.mxu1 %v1644_v2 }
  0xa8   :  { %1473 = vmatpush3.bf16.msra.mxu1 %v1562_v10  ;;  %v939_v10 = vpack.c.bf16 %v910_v4, %v910_v4 }
  0xa9   :  { %1474 = vmatprep.subr.bf16.mxu1 %v1644_v2 }
  0xac   :  { %1475 = vmatpush3.bf16.msra.mxu1 %v1563_v12 }
  0xad   :  { %1476 = vmatprep.subr.bf16.mxu1 %v1644_v2 }
  0xb0   :  { %1477 = vmatpush3.bf16.msra.mxu1 %v1564_v14 }
  0xb1   :  { %1478 = vmatprep.subr.bf16.mxu1 %v1644_v2 }
  0xb4   :  { %1479 = vmatpush3.bf16.msra.mxu1 %v1565_v16 }
 0x109   :  { %v1266_v51 = vpop.f32.mrb[0].mxu0 }
 0x10a   :  { %v1267_v54 = vpop.f32.mrb[1].mxu0  ;;  %v1288_v55 = vpop.f32.mrb[0].mxu1 }
 0x10b   :  { %v1268_v56 = vadd.f32 %v1267_v54, %v1266_v51  ;;  %v1269_v57 = vpop.f32.mrb[2].mxu0  ;;  %v1289_v58 = vpop.f32.mrb[1].mxu1 }
 0x10c   :  { %v1270_v59 = vpop.f32.mrb[3].mxu0  ;;  %v1290_v61 = vadd.f32 %v1289_v58, %v1288_v55  ;;  %v1291_v62 = vpop.f32.mrb[2].mxu1 }
 0x10d   :  { %v667_v60 = vadd.f32 %v1268_v56, %v1998_v53  ;;  %v1292_v63 = vpop.f32.mrb[3].mxu1 }
 0x10f   :  { %v707_v22 = vadd.f32 %v1290_v61, %v667_v60 }
 0x129   :  { %v1310_v24 = vpop.f32.mrb[4].mxu0 }
 0x12a   :  { %v1311_v30 = vpop.f32.mrb[5].mxu0  ;;  %v1332_v39 = vpop.f32.mrb[4].mxu1 }
 0x12b   :  { %v1312_v40 = vadd.f32 %v1311_v30, %v1310_v24  ;;  %v1313_v43 = vpop.f32.mrb[6].mxu0  ;;  %v1333_v44 = vpop.f32.mrb[5].mxu1 }
 0x12c   :  { %v1314_v45 = vpop.f32.mrb[7].mxu0  ;;  %v1334_v52 = vadd.f32 %v1333_v44, %v1332_v39  ;;  %v1335_v0 = vpop.f32.mrb[6].mxu1 }
 0x12d   :  { %v747_v48 = vadd.f32 %v1312_v40, %v707_v22  ;;  %v1336_v2 = vpop.f32.mrb[7].mxu1 }
 0x12f   :  { %v787_v6 = vadd.f32 %v1334_v52, %v747_v48 }
 0x131   :  { %v792_v8 = vmax.f32 %v787_v6, 0.0 }
 0x133   :  { %v793_v12 = vpack.c.bf16 %v792_v8, %v792_v8 }
 0x135   :  { %1461 = vmatmul.mubr.bf16.vlgmr.msra.gmra.mrb[8].mxu0 %v793_v12 }
 0x136   :  { %1370 = vmatpush3.bf16.msra.mxu0 %v1708_v3  ;;  %1016 = vmatprep.mubr.bf16.mxu0 %v939_v10  ;;  %v911_v3 = vcombine.high %v1978_v1, %v1978_v1 }
 0x137   :  { %1371 = vmatprep.subr.bf16.mxu0 %v1714_v5 }
 0x138   :  { %v925_v5 = vrot.slane %v911_v3, %v1788_v35  ;;  %v2107_v35 = vld [vmem:[#allocation20_spill] sm:$0xff] }
 0x13a   :  { %1372 = vmatpush3.bf16.msra.mxu0 %v1720_v7  ;;  %v927_v7 = vcombine.high %v925_v5, %v925_v5 }
 0x13b   :  { %1373 = vmatprep.subr.bf16.mxu0 %v1726_v9  ;;  %v938_v9 = vpack.c.bf16 %v908_v38, %v908_v38 }
 0x13e   :  { %1374 = vmatpush3.bf16.msra.mxu0 %v1732_v11  ;;  %v943_v11 = vpack.c.bf16 %v927_v7, %v927_v7 }
 0x13f   :  { %1375 = vmatprep.subr.bf16.mxu0 %v1738_v13  ;;  %v2098_v13 = vld [vmem:[#allocation11_spill] sm:$0xff] }
 0x142   :  { %1376 = vmatpush3.bf16.msra.mxu0 %v1744_v15  ;;  %v2099_v15 = vld [vmem:[#allocation12_spill] sm:$0xff] }
 0x143   :  { %1377 = vmatprep.subr.bf16.mxu0 %v1750_v17  ;;  %v2100_v17 = vld [vmem:[#allocation13_spill] sm:$0xff] }
 0x146   :  { %1378 = vmatpush3.bf16.msra.mxu0 %v1756_v19  ;;  %v2101_v19 = vld [vmem:[#allocation14_spill] sm:$0xff] }
 0x147   :  { %1379 = vmatprep.subr.bf16.mxu0 %v1762_v21  ;;  %v2102_v21 = vld [vmem:[#allocation15_spill] sm:$0xff] }
 0x14a   :  { %1380 = vmatpush3.bf16.msra.mxu0 %v1768_v26  ;;  %v2103_v26 = vld [vmem:[#allocation16_spill] sm:$0xff] }
 0x14b   :  { %1381 = vmatprep.subr.bf16.mxu0 %v1774_v28  ;;  %v2104_v28 = vld [vmem:[#allocation17_spill] sm:$0xff] }
 0x14e   :  { %1382 = vmatpush3.bf16.msra.mxu0 %v1780_v32  ;;  %v2105_v32 = vld [vmem:[#allocation18_spill] sm:$0xff] }
 0x14f   :  { %1383 = vmatprep.subr.bf16.mxu0 %v1786_v34  ;;  %v2106_v34 = vld [vmem:[#allocation19_spill] sm:$0xff] }
 0x152   :  { %1384 = vmatpush3.bf16.msra.mxu0 %v1794_v37  ;;  %v2108_v37 = vld [vmem:[#allocation21_spill] sm:$0xff] }
 0x153   :  { %1413 = vmatprep.subr.bf16.mxu0 %v1804_v42  ;;  %v942_v42 = vpack.c.bf16 %v925_v5, %v925_v5 }
 0x155   :  { %1017 = vmatmul.mubr.bf16.vlgmr.msra.gmra.mrb[12].mxu0 %v938_v9 }
 0x156   :  { %1414 = vmatpush3.bf16.msra.mxu0 %v1811_v49  ;;  %1096 = vmatprep.mubr.bf16.mxu0 %v943_v11  ;;  %v1363_v49 = vpop.f32.mrb[8].mxu1 }
 0x157   :  { %1415 = vmatprep.subr.bf16.mxu0 %v2098_v13  ;;  %v1364_v14 = vpop.f32.mrb[9].mxu1 }
 0x158   :  { %v1365_v16 = vadd.f32 %v1364_v14, %v1363_v49  ;;  %v1366_v18 = vpop.f32.mrb[10].mxu1 }
 0x159   :  { %v1367_v20 = vpop.f32.mrb[11].mxu1 }
 0x15a   :  { %1416 = vmatpush3.bf16.msra.mxu0 %v2099_v15  ;;  %v979_v51 = vadd.f32 %v1365_v16, %v1998_v53 }
 0x15b   :  { %1417 = vmatprep.subr.bf16.mxu0 %v2100_v17 }
 0x15e   :  { %1418 = vmatpush3.bf16.msra.mxu0 %v2101_v19 }
 0x15f   :  { %1419 = vmatprep.subr.bf16.mxu0 %v2102_v21 }
 0x162   :  { %1420 = vmatpush3.bf16.msra.mxu0 %v2103_v26 }
 0x163   :  { %1421 = vmatprep.subr.bf16.mxu0 %v2104_v28 }
 0x166   :  { %1422 = vmatpush3.bf16.msra.mxu0 %v2105_v32 }
 0x167   :  { %1423 = vmatprep.subr.bf16.mxu0 %v2106_v34 }
 0x16a   :  { %1424 = vmatpush3.bf16.msra.mxu0 %v2107_v35  ;;  %v1407_v25 = vpop.f32.mrb[12].mxu1 }
 0x16b   :  { %1425 = vmatprep.subr.bf16.mxu0 %v2108_v37  ;;  %v1408_v27 = vpop.f32.mrb[13].mxu1 }
 0x16c   :  { %v1409_v31 = vadd.f32 %v1408_v27, %v1407_v25  ;;  %v1410_v1 = vpop.f32.mrb[14].mxu1 }
 0x16d   :  { %v1411_v33 = vpop.f32.mrb[15].mxu1 }
 0x16e   :  { %1426 = vmatpush3.bf16.msra.mxu0 %v1880_v47  ;;  %v1241_v47 = vld [vmem:[%s2073_s5] ss:$0 sm:$0xff]  ;;  %s1646_s5 = smov [#allocation5]  }
 0x16f   :  { %1427 = vmatprep.subr.bf16.mxu0 %v1886_v50  ;;  %s1153_s2 = sshll.u32 %s1646_s5, 4  ;;  %s1154_s2 = int_to_ptr.vmem [resolvable:$true] %s1153_s2 }
 0x170   :  { %s1590_s15 = scalar_lea.vmem %s1154_s2, 32  ;;  %p1595_p9 = scmp.lt.s32.totalorder %s1154_s2, %s1154_s2 }
 0x171   :  { %p1591_p8 = scmp.ne.s32.totalorder %s1154_s2, %s1590_s15  ;;  %p1596_p10 = scmp.lt.s32.totalorder %s1590_s15, %s1590_s15 }
 0x172   :  { %1428 = vmatpush3.bf16.msra.mxu0 %v1895_v29 }
 0x173   :  { %p1597_p11 = por %p1596_p10, %p1595_p9 }
 0x175   :  { %1097 = vmatmul.mubr.bf16.vlgmr.msra.gmra.mrb[16].mxu0 %v942_v42  ;;  %p1598_p12 = pnand %p1597_p11, %p1591_p8 }
 0x208   :  { %v882_v36 = vpop.f32.mrb[8].mxu0 }
 0x209   :  { %v883_v50 = vadd.f32 %v1241_v47, %v882_v36  ;;  %v1462_v41 = vpop.f32.mrb[9].mxu0 }
 0x20a   :  { %v885_v29 = vpop.f32.mrb[10].mxu0 }
 0x20b   :  { %v1463_v46 = vpop.f32.mrb[11].mxu0  ;;  %889 = vst.msk [vmem:[#allocation5] sm:$0x3] %vm888_vm1, %v883_v50 }
 0x228   :  { %v1385_v54 = vpop.f32.mrb[12].mxu0 }
 0x229   :  { %v1386_v55 = vpop.f32.mrb[13].mxu0 }
 0x22a   :  { %v1387_v56 = vadd.f32 %v1386_v55, %v1385_v54  ;;  %v1388_v57 = vpop.f32.mrb[14].mxu0 }
 0x22b   :  { %v1389_v58 = vpop.f32.mrb[15].mxu0 }
 0x22c   :  { %v1019_v59 = vadd.f32 %v1387_v56, %v979_v51 }
 0x22e   :  { %v1059_v60 = vadd.f32 %v1409_v31, %v1019_v59 }
 0x248   :  { %v1429_v61 = vpop.f32.mrb[16].mxu0 }
 0x249   :  { %v1430_v62 = vpop.f32.mrb[17].mxu0 }
 0x24a   :  { %v1431_v63 = vadd.f32 %v1430_v62, %v1429_v61  ;;  %v1432_v22 = vpop.f32.mrb[18].mxu0 }
 0x24b   :  { %v1433_v23 = vpop.f32.mrb[19].mxu0 }
 0x24c   :  { %v1099_v24 = vadd.f32 %v1431_v63, %v1059_v60 }
 0x24e   :  { %v1104_v30 = vmax.f32 %v1099_v24, 0.0 }
 0x250   :  { %v1105_v38 = vpack.c.bf16 %v1104_v30, %v1104_v30 }
 0x252   :  { %1481 = vmatmul.mubr.bf16.vlgmr.msra.gmra.mrb[16].mxu1 %v1105_v38 }
 0x253   :  { %1601 = shalt.err (!%p1598_p12)
}
 0x254   :  { %s1602_s0 = scalar_lea.hbm %s2074_s6, 32 }
 0x255   :  { %p1603_p13 = scmp.ne.s32.totalorder %s2074_s6, %s1602_s0  ;;  %p1606_p0 = scmp.lt.u32.totalorder %s1602_s0, %s2074_s6 }
 0x257   :  { %p1608_p1 = pnand %p1606_p0, %p1603_p13 }
 0x259   :  { %1611 = shalt.err (!%p1608_p1)
}
 0x25a   :  { %1156 = dma.vmem_to_hbm [thread:$0]  %s1154_s2, 32, %s2074_s6, [#allocation4]  }
 0x25b   :  { %s1647_s24 = smov [#allocation6]  }
 0x25c   :  { %s1163_s25 = sshll.u32 %s1647_s24, 4  ;;  %s1164_s25 = int_to_ptr.vmem [resolvable:$true] %s1163_s25 }
 0x25d   :  { %s1612_s26 = scalar_lea.vmem %s1164_s25, 32  ;;  %p1617_p3 = scmp.lt.s32.totalorder %s1164_s25, %s1164_s25 }
 0x25e   :  { %p1613_p2 = scmp.ne.s32.totalorder %s1164_s25, %s1612_s26  ;;  %p1618_p4 = scmp.lt.s32.totalorder %s1612_s26, %s1612_s26 }
 0x260   :  { %p1619_p5 = por %p1618_p4, %p1617_p3 }
 0x262   :  { %p1620_p6 = pnand %p1619_p5, %p1613_p2 }
 0x325   :  { %v1140_v53 = vpop.f32.mrb[16].mxu1 }
 0x326   :  { %v1141_v39 = vadd.f32 %v1241_v47, %v1140_v53  ;;  %v1482_v40 = vpop.f32.mrb[17].mxu1 }
 0x327   :  { %v1143_v43 = vpop.f32.mrb[18].mxu1 }
 0x328   :  { %v1483_v44 = vpop.f32.mrb[19].mxu1  ;;  %1146 = vst.msk [vmem:[#allocation6] sm:$0x3] %vm888_vm1, %v1141_v39 }
 0x329   :  { %1623 = shalt.err (!%p1620_p6)
}
 0x32a   :  { %s1624_s6 = scalar_lea.hbm %s2075_s7, 32 }
 0x32b   :  { %p1625_p7 = scmp.ne.s32.totalorder %s2075_s7, %s1624_s6  ;;  %p1628_p8 = scmp.lt.u32.totalorder %s1624_s6, %s2075_s7 }
 0x32d   :  { %p1630_p9 = pnand %p1628_p8, %p1625_p7 }
 0x32f   :  { %1633 = shalt.err (!%p1630_p9)
}
 0x330   :  { %1166 = dma.vmem_to_hbm [thread:$0]  %s1164_s25, 32, %s2075_s7, [#allocation7]  }
 0x331   :  { %1636 = dma.done.wait [#allocation4], 32  }
 0x332   :  { %1637 = vsyncadd [#allocation4], 4294967264 }
 0x333   :  { %1638 = dma.done.wait [#allocation7], 32  }
 0x334   :  { %1639 = vsyncadd [#allocation7], 4294967264 }
 0x335   :  { %1173 = vsyncpa [#allocation3], 1 }
 0x336   :  { %1174 = vsyncpa [#allocation4], 1 }
 0x337   :  { %1175 = vsyncpa [#allocation7], 1 }

</bundles_post_ra>
